<compile_context>
chip_gen: v7x
topology: tpu7x:2x2x1
jax: 0.10.0
libtpu: 0.0.40
codegen_flags: <defaults>
</compile_context>

<pallas_src>
import numpy as np
import jax
import jax.numpy as jnp
from jax.experimental import pallas as pl
from jax.experimental.pallas import tpu as pltpu

BN_EPS = 1e-5


# ---------------------------------------------------------------------------
# Static weight / layout constants (numpy, built once outside the kernel).
# ---------------------------------------------------------------------------

def _conv_row_weights(wt, win):
    """torch ConvTranspose2d weight (Cin, Cout, 4, 4) -> 4 row-matmul pieces.

    A k=4/s=2/p=1 transpose conv maps input row ih to output row oh=2*ih-1+kh.
    Splitting output rows by parity (Xp = zero-padded input rows, lanes=(w,cin)):
      even rows 2i  : y = Xp[i]   @ W(kh=3) + Xp[i+1] @ W(kh=1)
      odd  rows 2i+1: y = Xp[i+1] @ W(kh=2) + Xp[i+2] @ W(kh=0)
    The width / kw structure is folded into each piece -> (Win*Cin, Wout*Cout)
    weights, so the matmul output lanes (w_out, cout) are all valid data.
    Returns (4, Win*Cin, 2*Win*Cout) ordered [kh=3, kh=1, kh=2, kh=0].
    """
    cin, cout = wt.shape[0], wt.shape[1]
    wout = 2 * win

    def piece(kh):
        m = np.zeros((win * cin, wout * cout), np.float32)
        for iw in range(win):
            for ow in range(wout):
                kw = ow + 1 - 2 * iw
                if 0 <= kw < 4:
                    m[iw * cin:(iw + 1) * cin, ow * cout:(ow + 1) * cout] = wt[:, :, kh, kw]
        return m

    return np.stack([piece(3), piece(1), piece(2), piece(0)], axis=0)


def _pad_scatter_mats(h_img, batch):
    """0/1 matrices mapping the previous layer's parity-stacked output rows
    ((h_img//2)*B rows per parity) into this layer's zero-padded image-row
    ordered buffer ((h_img+2)*B rows).  Applied on the MXU in-kernel, this does
    the depth-to-space interleave + conv padding with no relayout ops."""
    half = h_img // 2
    pe = np.zeros(((h_img + 2) * batch, half * batch), np.float32)
    po = np.zeros_like(pe)
    for i in range(half):
        for b in range(batch):
            pe[(2 * i + 1) * batch + b, i * batch + b] = 1.0   # image row 2i
            po[(2 * i + 2) * batch + b, i * batch + b] = 1.0   # image row 2i+1
    return pe, po


def _group_mats(wout, cout):
    """(Wout*Cout, Cout) per-channel reduce matrix and its transpose for
    re-broadcasting per-channel BN scale/shift across the (w, c) lane axis."""
    g = np.zeros((wout * cout, cout), np.float32)
    for w in range(wout):
        for c in range(cout):
            g[w * cout + c, c] = 1.0
    return g, np.ascontiguousarray(g.T)


# ---------------------------------------------------------------------------
# Fused whole-network kernel.
# ---------------------------------------------------------------------------

def _build_kernel(dims, batch):
    n_layers = len(dims)

    def kernel(*refs):
        it = iter(refs)
        z_ref = next(it)
        wfc_ref = next(it)
        bfc_ref = next(it)
        layer_refs = []
        for l, d in enumerate(dims):
            lr = {"w": next(it)}
            if d["bn"]:
                lr["gmat"] = next(it)
                lr["emat"] = next(it)
                lr["gamma"] = next(it)
                lr["beta"] = next(it)
            if l > 0:
                lr["pe"] = next(it)
                lr["po"] = next(it)
            layer_refs.append(lr)
        out_ref = next(it)
        xp_refs = [next(it) for _ in range(n_layers)]

        f32 = jnp.float32
        bf16 = jnp.bfloat16

        # --- fused fc: write the 4x4 seed image (rows = (h, b), lanes = (w, c))
        #     straight into layer 0's zero-padded row buffer. ---
        z = z_ref[...]
        d0 = dims[0]
        n0 = d0["win"] * d0["cin"]
        xp0 = xp_refs[0]
        zero_row = jnp.zeros((batch, n0), f32)
        xp0[0:batch, :] = zero_row
        xp0[(d0["hin"] + 1) * batch:(d0["hin"] + 2) * batch, :] = zero_row
        for h in range(4):
            row = jnp.dot(z, wfc_ref[h], preferred_element_type=f32) + bfc_ref[h]
            xp0[(h + 1) * batch:(h + 2) * batch, :] = row

        y_even = y_odd = None
        for l, d in enumerate(dims):
            lr = layer_refs[l]
            hin, win, wout = d["hin"], d["win"], 2 * d["win"]
            m = hin * batch
            xp = xp_refs[l]

            if l > 0:
                # depth-to-space + zero padding of the previous activations via
                # constant 0/1 row-scatter matmuls (no relayout ops).
                xp[...] = (jnp.dot(lr["pe"][...], y_even, preferred_element_type=f32)
                           + jnp.dot(lr["po"][...], y_odd, preferred_element_type=f32))

            x_lo = xp[0:m, :].astype(bf16)
            x_mid = xp[batch:batch + m, :].astype(bf16)
            x_hi = xp[2 * batch:2 * batch + m, :].astype(bf16)
            w = lr["w"]
            y_even = (jnp.dot(x_lo, w[0], preferred_element_type=f32)
                      + jnp.dot(x_mid, w[1], preferred_element_type=f32))
            y_odd = (jnp.dot(x_mid, w[2], preferred_element_type=f32)
                     + jnp.dot(x_hi, w[3], preferred_element_type=f32))

            if d["bn"]:
                # Exact training-mode BatchNorm2d: the whole batch is in VMEM,
                # so use two-pass mean / variance, then affine + ReLU.
                gmat = lr["gmat"][...]
                emat = lr["emat"][...]
                ntot = float(2 * m * wout)
                s = (jnp.sum(y_even, axis=0, keepdims=True)
                     + jnp.sum(y_odd, axis=0, keepdims=True))
                mean_c = jnp.dot(s, gmat, preferred_element_type=f32) / ntot
                mean_row = jnp.dot(mean_c, emat, preferred_element_type=f32)
                de = y_even - mean_row
                do = y_odd - mean_row
                ss = (jnp.sum(de * de, axis=0, keepdims=True)
                      + jnp.sum(do * do, axis=0, keepdims=True))
                var_c = jnp.dot(ss, gmat, preferred_element_type=f32) / ntot
                scale_c = lr["gamma"][...] * jax.lax.rsqrt(var_c + BN_EPS)
                shift_c = lr["beta"][...] - mean_c * scale_c
                scale_row = jnp.dot(scale_c, emat, preferred_element_type=f32)
                shift_row = jnp.dot(shift_c, emat, preferred_element_type=f32)
                y_even = jnp.maximum(y_even * scale_row + shift_row, 0.0)
                y_odd = jnp.maximum(y_odd * scale_row + shift_row, 0.0)
            else:
                # final layer: tanh, store parity-stacked rows.
                out_ref[0:m, :] = jnp.tanh(y_even)
                out_ref[m:2 * m, :] = jnp.tanh(y_odd)

    return kernel


# ---------------------------------------------------------------------------
# Generator
# ---------------------------------------------------------------------------

class Generator:
    """Pallas-TPU port of the PyTorch DCGAN Generator (single fused kernel)."""

    def __init__(self, z_size, conv_dim, img_size, key):
        self.z_size = z_size
        self.conv_dim = conv_dim
        self.img_size = img_size
        self.nlayers = int(np.log2(img_size)) - 2
        c0 = conv_dim * 2 ** (self.nlayers - 1)
        self.c0 = c0
        fc_out = c0 * 16

        n_blocks = self.nlayers - 1
        keys = jax.random.split(key, 2 + 3 * n_blocks + 1)
        ki = iter(keys)

        # ---- nn.Linear(z_size, c0*4*4), torch default init ----
        bound = 1.0 / np.sqrt(z_size)
        fc_w = np.asarray(jax.random.uniform(next(ki), (fc_out, z_size),
                                             jnp.float32, -bound, bound))
        fc_b = np.asarray(jax.random.uniform(next(ki), (fc_out,),
                                             jnp.float32, -bound, bound))
        self._fc_raw = (jnp.asarray(fc_w), jnp.asarray(fc_b))      # for the reference
        # The torch fc output is viewed as NCHW (c0, 4, 4); re-index its columns
        # once so row h of the seed image comes out of one (Z, 4*c0) matmul with
        # lanes ordered (w, c).
        wfc = np.zeros((4, z_size, 4 * c0), np.float32)
        bfc = np.zeros((4, 1, 4 * c0), np.float32)
        for h in range(4):
            perm = np.array([c * 16 + h * 4 + w for w in range(4) for c in range(c0)])
            wfc[h] = fc_w[perm, :].T
            bfc[h, 0] = fc_b[perm]
        self.wfc = jnp.asarray(wfc, jnp.bfloat16)
        self.bfc = jnp.asarray(bfc, jnp.float32)

        # ---- transpose-conv blocks ----
        self.layer_dims = []
        self.layer_params = []
        self._raw_conv = []                                        # for the reference
        hin = 4
        for i in range(self.nlayers - 1, 0, -1):
            cin = conv_dim * 2 ** i
            cout = conv_dim * 2 ** (i - 1)
            wb = 1.0 / np.sqrt(cin * 16)
            wt = np.asarray(jax.random.uniform(next(ki), (cin, cout, 4, 4),
                                               jnp.float32, -wb, wb))
            gamma = np.asarray(1.0 + 0.1 * jax.random.normal(next(ki), (cout,), jnp.float32))
            beta = np.asarray(0.1 * jax.random.normal(next(ki), (cout,), jnp.float32))
            gmat, emat = _group_mats(2 * hin, cout)
            self.layer_dims.append(dict(hin=hin, win=hin, cin=cin, cout=cout, bn=True))
            self.layer_params.append(dict(
                w=jnp.asarray(_conv_row_weights(wt, hin), jnp.bfloat16),
                gmat=jnp.asarray(gmat), emat=jnp.asarray(emat),
                gamma=jnp.asarray(gamma.reshape(1, cout)),
                beta=jnp.asarray(beta.reshape(1, cout))))
            self._raw_conv.append((jnp.asarray(wt), jnp.asarray(gamma), jnp.asarray(beta)))
            hin *= 2

        # final transpose conv to 3 channels (no BN), then Tanh
        cin = conv_dim
        wb = 1.0 / np.sqrt(cin * 16)
        wt = np.asarray(jax.random.uniform(next(ki), (cin, 3, 4, 4),
                                           jnp.float32, -wb, wb))
        self.layer_dims.append(dict(hin=hin, win=hin, cin=cin, cout=3, bn=False))
        self.layer_params.append(dict(w=jnp.asarray(_conv_row_weights(wt, hin), jnp.bfloat16)))
        self._raw_conv.append((jnp.asarray(wt), None, None))

    def __call__(self, z):
        batch = z.shape[0]
        img = self.img_size
        dims = self.layer_dims

        inputs = [z.astype(jnp.bfloat16), self.wfc, self.bfc]
        for l, (d, p) in enumerate(zip(dims, self.layer_params)):
            inputs.append(p["w"])
            if d["bn"]:
                inputs += [p["gmat"], p["emat"], p["gamma"], p["beta"]]
            if l > 0:
                pe, po = _pad_scatter_mats(d["hin"], batch)
                inputs += [jnp.asarray(pe), jnp.asarray(po)]

        scratch = [pltpu.VMEM(((d["hin"] + 2) * batch, d["win"] * d["cin"]), jnp.float32)
                   for d in dims]

        out_flat = pl.pallas_call(
            _build_kernel(dims, batch),
            out_shape=jax.ShapeDtypeStruct((img * batch, img * 3), jnp.float32),
            in_specs=[pl.BlockSpec(memory_space=pltpu.MemorySpace.VMEM)] * len(inputs),
            out_specs=pl.BlockSpec(memory_space=pltpu.MemorySpace.VMEM),
            scratch_shapes=scratch,
        )(*inputs)

        # TODO(synk): the final parity-interleave + NHWC->NCHW transpose of the
        # (tiny) network output stays in XLA; doing it in-kernel would need a
        # sublane<->lane relayout for no measurable gain.
        arr = out_flat.reshape(2, img // 2, batch, img, 3)
        return jnp.transpose(arr, (2, 4, 1, 0, 3)).reshape(batch, 3, img, img)


# ---------------------------------------------------------------------------
# Pure-XLA float32 reference (matches the PyTorch module, training-mode BN).
# ---------------------------------------------------------------------------

def _reference_forward(gen, z):
    fc_w, fc_b = gen._fc_raw
    x = z @ fc_w.T + fc_b
    x = x.reshape(z.shape[0], gen.c0, 4, 4)
    for wt, gamma, beta in gen._raw_conv:
        wf = jnp.transpose(jnp.flip(wt, (2, 3)), (1, 0, 2, 3))
        x = jax.lax.conv_general_dilated(
            x, wf, window_strides=(1, 1), padding=((2, 2), (2, 2)),
            lhs_dilation=(2, 2), dimension_numbers=("NCHW", "OIHW", "NCHW"))
        if gamma is not None:
            mean = jnp.mean(x, axis=(0, 2, 3), keepdims=True)
            var = jnp.mean((x - mean) ** 2, axis=(0, 2, 3), keepdims=True)
            x = (x - mean) * jax.lax.rsqrt(var + BN_EPS)
            x = x * gamma.reshape(1, -1, 1, 1) + beta.reshape(1, -1, 1, 1)
            x = jnp.maximum(x, 0.0)
        else:
            x = jnp.tanh(x)
    return x


# ---------------------------------------------------------------------------
# main
# ---------------------------------------------------------------------------

if __name__ == "__main__":
    key = jax.random.PRNGKey(0)
    pkey, zkey = jax.random.split(key)

    z_size, conv_dim, img_size, batch = 32, 8, 16, 2
    gen = Generator(z_size, conv_dim, img_size, pkey)

    z = jax.random.normal(zkey, (batch, z_size), jnp.float32)
    forward = jax.jit(gen.__call__)
    img = jax.block_until_ready(forward(z))

    assert img.shape == (batch, 3, img_size, img_size), img.shape
    assert bool(jnp.all(jnp.isfinite(img)))
    assert bool(jnp.all(jnp.abs(img) <= 1.0))          # tanh range

    ref = _reference_forward(gen, z.astype(jnp.float32))
    err = float(jnp.max(jnp.abs(img - ref)))
    assert err < 7e-2, err                              # bf16 matmul operands vs f32 ref

    print("KERNEL_OK")
</pallas_src>

<mosaic_0001>
module attributes {stable_mosaic.version = 11 : i64} {
  func.func @kernel(%arg0: memref<2x32xbf16, #tpu.memory_space<vmem>>, %arg1: memref<4x32x64xbf16, #tpu.memory_space<vmem>>, %arg2: memref<4x1x64xf32, #tpu.memory_space<vmem>>, %arg3: memref<4x64x64xbf16, #tpu.memory_space<vmem>>, %arg4: memref<64x8xf32, #tpu.memory_space<vmem>>, %arg5: memref<8x64xf32, #tpu.memory_space<vmem>>, %arg6: memref<1x8xf32, #tpu.memory_space<vmem>>, %arg7: memref<1x8xf32, #tpu.memory_space<vmem>>, %arg8: memref<4x64x48xbf16, #tpu.memory_space<vmem>>, %arg9: memref<20x8xf32, #tpu.memory_space<vmem>>, %arg10: memref<20x8xf32, #tpu.memory_space<vmem>>, %arg11: memref<32x48xf32, #tpu.memory_space<vmem>>, %arg12: memref<12x64xf32, #tpu.memory_space<vmem>>, %arg13: memref<20x64xf32, #tpu.memory_space<vmem>>) attributes {dimension_semantics = [], scalar_prefetch = 0 : i64, scratch_operands = 2 : i64, tpu.core_type = #tpu.core_type<tc>} {
    %c0 = arith.constant 0 : index
    %c0_0 = arith.constant 0 : index
    %0 = vector.load %arg0[%c0, %c0_0] : memref<2x32xbf16, #tpu.memory_space<vmem>>, vector<2x32xbf16>
    %cst = arith.constant 0.000000e+00 : f32
    %1 = vector.broadcast %cst : f32 to vector<2x64xf32>
    %c0_1 = arith.constant 0 : index
    %c0_2 = arith.constant 0 : index
    %2 = vector.load %arg12[%c0_1, %c0_2] : memref<12x64xf32, #tpu.memory_space<vmem>>, vector<2x64xf32>
    tpu.vector_store %arg12[%c0_1, %c0_2], %1 {strides = array<i32>} : memref<12x64xf32, #tpu.memory_space<vmem>>, vector<2x64xf32>,
    %c10 = arith.constant 10 : index
    %c0_3 = arith.constant 0 : index
    %3 = vector.load %arg12[%c10, %c0_3] : memref<12x64xf32, #tpu.memory_space<vmem>>, vector<2x64xf32>
    tpu.vector_store %arg12[%c10, %c0_3], %1 {strides = array<i32>} : memref<12x64xf32, #tpu.memory_space<vmem>>, vector<2x64xf32>,
    %c0_4 = arith.constant 0 : index
    %c0_5 = arith.constant 0 : index
    %c0_6 = arith.constant 0 : index
    %4 = vector.load %arg1[%c0_4, %c0_5, %c0_6] : memref<4x32x64xbf16, #tpu.memory_space<vmem>>, vector<1x32x64xbf16>
    %5 = vector.shape_cast %4 : vector<1x32x64xbf16> to vector<32x64xbf16>
    %cst_7 = arith.constant dense<0.000000e+00> : vector<2x64xf32>
    %6 = tpu.matmul %0, %5, %cst_7 {dimension_numbers = #tpu.dot_dimension_numbers<[1], [0], [0], [1], [0, 0, 1, 1], [], []>} : vector<2x32xbf16>, vector<32x64xbf16>, vector<2x64xf32> -> vector<2x64xf32>
    %c0_8 = arith.constant 0 : index
    %c0_9 = arith.constant 0 : index
    %c0_10 = arith.constant 0 : index
    %7 = vector.load %arg2[%c0_8, %c0_9, %c0_10] : memref<4x1x64xf32, #tpu.memory_space<vmem>>, vector<1x1x64xf32>
    %8 = vector.shape_cast %7 : vector<1x1x64xf32> to vector<1x64xf32>
    %9 = vector.broadcast %8 : vector<1x64xf32> to vector<2x64xf32>
    %10 = arith.addf %6, %9 : vector<2x64xf32>
    %c2 = arith.constant 2 : index
    %c0_11 = arith.constant 0 : index
    %11 = vector.load %arg12[%c2, %c0_11] : memref<12x64xf32, #tpu.memory_space<vmem>>, vector<2x64xf32>
    tpu.vector_store %arg12[%c2, %c0_11], %10 {strides = array<i32>} : memref<12x64xf32, #tpu.memory_space<vmem>>, vector<2x64xf32>,
    %c1 = arith.constant 1 : index
    %c0_12 = arith.constant 0 : index
    %c0_13 = arith.constant 0 : index
    %12 = vector.load %arg1[%c1, %c0_12, %c0_13] : memref<4x32x64xbf16, #tpu.memory_space<vmem>>, vector<1x32x64xbf16>
    %13 = vector.shape_cast %12 : vector<1x32x64xbf16> to vector<32x64xbf16>
    %cst_14 = arith.constant dense<0.000000e+00> : vector<2x64xf32>
    %14 = tpu.matmul %0, %13, %cst_14 {dimension_numbers = #tpu.dot_dimension_numbers<[1], [0], [0], [1], [0, 0, 1, 1], [], []>} : vector<2x32xbf16>, vector<32x64xbf16>, vector<2x64xf32> -> vector<2x64xf32>
    %c1_15 = arith.constant 1 : index
    %c0_16 = arith.constant 0 : index
    %c0_17 = arith.constant 0 : index
    %15 = vector.load %arg2[%c1_15, %c0_16, %c0_17] : memref<4x1x64xf32, #tpu.memory_space<vmem>>, vector<1x1x64xf32>
    %16 = vector.shape_cast %15 : vector<1x1x64xf32> to vector<1x64xf32>
    %17 = vector.broadcast %16 : vector<1x64xf32> to vector<2x64xf32>
    %18 = arith.addf %14, %17 : vector<2x64xf32>
    %c4 = arith.constant 4 : index
    %c0_18 = arith.constant 0 : index
    %19 = vector.load %arg12[%c4, %c0_18] : memref<12x64xf32, #tpu.memory_space<vmem>>, vector<2x64xf32>
    tpu.vector_store %arg12[%c4, %c0_18], %18 {strides = array<i32>} : memref<12x64xf32, #tpu.memory_space<vmem>>, vector<2x64xf32>,
    %c2_19 = arith.constant 2 : index
    %c0_20 = arith.constant 0 : index
    %c0_21 = arith.constant 0 : index
    %20 = vector.load %arg1[%c2_19, %c0_20, %c0_21] : memref<4x32x64xbf16, #tpu.memory_space<vmem>>, vector<1x32x64xbf16>
    %21 = vector.shape_cast %20 : vector<1x32x64xbf16> to vector<32x64xbf16>
    %cst_22 = arith.constant dense<0.000000e+00> : vector<2x64xf32>
    %22 = tpu.matmul %0, %21, %cst_22 {dimension_numbers = #tpu.dot_dimension_numbers<[1], [0], [0], [1], [0, 0, 1, 1], [], []>} : vector<2x32xbf16>, vector<32x64xbf16>, vector<2x64xf32> -> vector<2x64xf32>
    %c2_23 = arith.constant 2 : index
    %c0_24 = arith.constant 0 : index
    %c0_25 = arith.constant 0 : index
    %23 = vector.load %arg2[%c2_23, %c0_24, %c0_25] : memref<4x1x64xf32, #tpu.memory_space<vmem>>, vector<1x1x64xf32>
    %24 = vector.shape_cast %23 : vector<1x1x64xf32> to vector<1x64xf32>
    %25 = vector.broadcast %24 : vector<1x64xf32> to vector<2x64xf32>
    %26 = arith.addf %22, %25 : vector<2x64xf32>
    %c6 = arith.constant 6 : index
    %c0_26 = arith.constant 0 : index
    %27 = vector.load %arg12[%c6, %c0_26] : memref<12x64xf32, #tpu.memory_space<vmem>>, vector<2x64xf32>
    tpu.vector_store %arg12[%c6, %c0_26], %26 {strides = array<i32>} : memref<12x64xf32, #tpu.memory_space<vmem>>, vector<2x64xf32>,
    %c3 = arith.constant 3 : index
    %c0_27 = arith.constant 0 : index
    %c0_28 = arith.constant 0 : index
    %28 = vector.load %arg1[%c3, %c0_27, %c0_28] : memref<4x32x64xbf16, #tpu.memory_space<vmem>>, vector<1x32x64xbf16>
    %29 = vector.shape_cast %28 : vector<1x32x64xbf16> to vector<32x64xbf16>
    %cst_29 = arith.constant dense<0.000000e+00> : vector<2x64xf32>
    %30 = tpu.matmul %0, %29, %cst_29 {dimension_numbers = #tpu.dot_dimension_numbers<[1], [0], [0], [1], [0, 0, 1, 1], [], []>} : vector<2x32xbf16>, vector<32x64xbf16>, vector<2x64xf32> -> vector<2x64xf32>
    %c3_30 = arith.constant 3 : index
    %c0_31 = arith.constant 0 : index
    %c0_32 = arith.constant 0 : index
    %31 = vector.load %arg2[%c3_30, %c0_31, %c0_32] : memref<4x1x64xf32, #tpu.memory_space<vmem>>, vector<1x1x64xf32>
    %32 = vector.shape_cast %31 : vector<1x1x64xf32> to vector<1x64xf32>
    %33 = vector.broadcast %32 : vector<1x64xf32> to vector<2x64xf32>
    %34 = arith.addf %30, %33 : vector<2x64xf32>
    %c8 = arith.constant 8 : index
    %c0_33 = arith.constant 0 : index
    %35 = vector.load %arg12[%c8, %c0_33] : memref<12x64xf32, #tpu.memory_space<vmem>>, vector<2x64xf32>
    tpu.vector_store %arg12[%c8, %c0_33], %34 {strides = array<i32>} : memref<12x64xf32, #tpu.memory_space<vmem>>, vector<2x64xf32>,
    %c0_34 = arith.constant 0 : index
    %c0_35 = arith.constant 0 : index
    %36 = vector.load %arg12[%c0_34, %c0_35] : memref<12x64xf32, #tpu.memory_space<vmem>>, vector<8x64xf32>
    %37 = arith.truncf %36 : vector<8x64xf32> to vector<8x64xbf16>
    %c2_36 = arith.constant 2 : index
    %c0_37 = arith.constant 0 : index
    %38 = vector.load %arg12[%c2_36, %c0_37] : memref<12x64xf32, #tpu.memory_space<vmem>>, vector<8x64xf32>
    %39 = arith.truncf %38 : vector<8x64xf32> to vector<8x64xbf16>
    %c4_38 = arith.constant 4 : index
    %c0_39 = arith.constant 0 : index
    %40 = vector.load %arg12[%c4_38, %c0_39] : memref<12x64xf32, #tpu.memory_space<vmem>>, vector<8x64xf32>
    %41 = arith.truncf %40 : vector<8x64xf32> to vector<8x64xbf16>
    %c0_40 = arith.constant 0 : index
    %c0_41 = arith.constant 0 : index
    %c0_42 = arith.constant 0 : index
    %42 = vector.load %arg3[%c0_40, %c0_41, %c0_42] : memref<4x64x64xbf16, #tpu.memory_space<vmem>>, vector<1x64x64xbf16>
    %43 = vector.shape_cast %42 : vector<1x64x64xbf16> to vector<64x64xbf16>
    %cst_43 = arith.constant dense<0.000000e+00> : vector<8x64xf32>
    %44 = tpu.matmul %37, %43, %cst_43 {dimension_numbers = #tpu.dot_dimension_numbers<[1], [0], [0], [1], [0, 0, 1, 1], [], []>} : vector<8x64xbf16>, vector<64x64xbf16>, vector<8x64xf32> -> vector<8x64xf32>
    %c1_44 = arith.constant 1 : index
    %c0_45 = arith.constant 0 : index
    %c0_46 = arith.constant 0 : index
    %45 = vector.load %arg3[%c1_44, %c0_45, %c0_46] : memref<4x64x64xbf16, #tpu.memory_space<vmem>>, vector<1x64x64xbf16>
    %46 = vector.shape_cast %45 : vector<1x64x64xbf16> to vector<64x64xbf16>
    %cst_47 = arith.constant dense<0.000000e+00> : vector<8x64xf32>
    %47 = tpu.matmul %39, %46, %cst_47 {dimension_numbers = #tpu.dot_dimension_numbers<[1], [0], [0], [1], [0, 0, 1, 1], [], []>} : vector<8x64xbf16>, vector<64x64xbf16>, vector<8x64xf32> -> vector<8x64xf32>
    %48 = arith.addf %44, %47 : vector<8x64xf32>
    %c2_48 = arith.constant 2 : index
    %c0_49 = arith.constant 0 : index
    %c0_50 = arith.constant 0 : index
    %49 = vector.load %arg3[%c2_48, %c0_49, %c0_50] : memref<4x64x64xbf16, #tpu.memory_space<vmem>>, vector<1x64x64xbf16>
    %50 = vector.shape_cast %49 : vector<1x64x64xbf16> to vector<64x64xbf16>
    %cst_51 = arith.constant dense<0.000000e+00> : vector<8x64xf32>
    %51 = tpu.matmul %39, %50, %cst_51 {dimension_numbers = #tpu.dot_dimension_numbers<[1], [0], [0], [1], [0, 0, 1, 1], [], []>} : vector<8x64xbf16>, vector<64x64xbf16>, vector<8x64xf32> -> vector<8x64xf32>
    %c3_52 = arith.constant 3 : index
    %c0_53 = arith.constant 0 : index
    %c0_54 = arith.constant 0 : index
    %52 = vector.load %arg3[%c3_52, %c0_53, %c0_54] : memref<4x64x64xbf16, #tpu.memory_space<vmem>>, vector<1x64x64xbf16>
    %53 = vector.shape_cast %52 : vector<1x64x64xbf16> to vector<64x64xbf16>
    %cst_55 = arith.constant dense<0.000000e+00> : vector<8x64xf32>
    %54 = tpu.matmul %41, %53, %cst_55 {dimension_numbers = #tpu.dot_dimension_numbers<[1], [0], [0], [1], [0, 0, 1, 1], [], []>} : vector<8x64xbf16>, vector<64x64xbf16>, vector<8x64xf32> -> vector<8x64xf32>
    %55 = arith.addf %51, %54 : vector<8x64xf32>
    %c0_56 = arith.constant 0 : index
    %c0_57 = arith.constant 0 : index
    %56 = vector.load %arg4[%c0_56, %c0_57] : memref<64x8xf32, #tpu.memory_space<vmem>>, vector<64x8xf32>
    %c0_58 = arith.constant 0 : index
    %c0_59 = arith.constant 0 : index
    %57 = vector.load %arg5[%c0_58, %c0_59] : memref<8x64xf32, #tpu.memory_space<vmem>>, vector<8x64xf32>
    %cst_60 = arith.constant dense<0.000000e+00> : vector<64xf32>
    %58 = vector.multi_reduction <add>, %48, %cst_60 [0] : vector<8x64xf32> to vector<64xf32>
    %59 = vector.shape_cast %58 : vector<64xf32> to vector<1x64xf32>
    %cst_61 = arith.constant dense<0.000000e+00> : vector<64xf32>
    %60 = vector.multi_reduction <add>, %55, %cst_61 [0] : vector<8x64xf32> to vector<64xf32>
    %61 = vector.shape_cast %60 : vector<64xf32> to vector<1x64xf32>
    %62 = arith.addf %59, %61 : vector<1x64xf32>
    %cst_62 = arith.constant dense<0.000000e+00> : vector<1x8xf32>
    %63 = tpu.matmul %62, %56, %cst_62 {dimension_numbers = #tpu.dot_dimension_numbers<[1], [0], [0], [1], [0, 0, 1, 1], [], []>} : vector<1x64xf32>, vector<64x8xf32>, vector<1x8xf32> -> vector<1x8xf32>
    %cst_63 = arith.constant 1.280000e+02 : f32
    %64 = vector.broadcast %cst_63 : f32 to vector<1x8xf32>
    %65 = arith.divf %63, %64 : vector<1x8xf32>
    %cst_64 = arith.constant dense<0.000000e+00> : vector<1x64xf32>
    %66 = tpu.matmul %65, %57, %cst_64 {dimension_numbers = #tpu.dot_dimension_numbers<[1], [0], [0], [1], [0, 0, 1, 1], [], []>} : vector<1x8xf32>, vector<8x64xf32>, vector<1x64xf32> -> vector<1x64xf32>
    %67 = vector.broadcast %66 : vector<1x64xf32> to vector<8x64xf32>
    %68 = arith.subf %48, %67 : vector<8x64xf32>
    %69 = vector.broadcast %66 : vector<1x64xf32> to vector<8x64xf32>
    %70 = arith.subf %55, %69 : vector<8x64xf32>
    %71 = arith.mulf %68, %68 : vector<8x64xf32>
    %cst_65 = arith.constant dense<0.000000e+00> : vector<64xf32>
    %72 = vector.multi_reduction <add>, %71, %cst_65 [0] : vector<8x64xf32> to vector<64xf32>
    %73 = vector.shape_cast %72 : vector<64xf32> to vector<1x64xf32>
    %74 = arith.mulf %70, %70 : vector<8x64xf32>
    %cst_66 = arith.constant dense<0.000000e+00> : vector<64xf32>
    %75 = vector.multi_reduction <add>, %74, %cst_66 [0] : vector<8x64xf32> to vector<64xf32>
    %76 = vector.shape_cast %75 : vector<64xf32> to vector<1x64xf32>
    %77 = arith.addf %73, %76 : vector<1x64xf32>
    %cst_67 = arith.constant dense<0.000000e+00> : vector<1x8xf32>
    %78 = tpu.matmul %77, %56, %cst_67 {dimension_numbers = #tpu.dot_dimension_numbers<[1], [0], [0], [1], [0, 0, 1, 1], [], []>} : vector<1x64xf32>, vector<64x8xf32>, vector<1x8xf32> -> vector<1x8xf32>
    %cst_68 = arith.constant 1.280000e+02 : f32
    %79 = vector.broadcast %cst_68 : f32 to vector<1x8xf32>
    %80 = arith.divf %78, %79 : vector<1x8xf32>
    %c0_69 = arith.constant 0 : index
    %c0_70 = arith.constant 0 : index
    %81 = vector.load %arg6[%c0_69, %c0_70] : memref<1x8xf32, #tpu.memory_space<vmem>>, vector<1x8xf32>
    %cst_71 = arith.constant 9.99999974E-6 : f32
    %82 = vector.broadcast %cst_71 : f32 to vector<1x8xf32>
    %83 = arith.addf %80, %82 : vector<1x8xf32>
    %84 = math.rsqrt %83 : vector<1x8xf32>
    %85 = arith.mulf %81, %84 : vector<1x8xf32>
    %c0_72 = arith.constant 0 : index
    %c0_73 = arith.constant 0 : index
    %86 = vector.load %arg7[%c0_72, %c0_73] : memref<1x8xf32, #tpu.memory_space<vmem>>, vector<1x8xf32>
    %87 = arith.mulf %65, %85 : vector<1x8xf32>
    %88 = arith.subf %86, %87 : vector<1x8xf32>
    %cst_74 = arith.constant dense<0.000000e+00> : vector<1x64xf32>
    %89 = tpu.matmul %85, %57, %cst_74 {dimension_numbers = #tpu.dot_dimension_numbers<[1], [0], [0], [1], [0, 0, 1, 1], [], []>} : vector<1x8xf32>, vector<8x64xf32>, vector<1x64xf32> -> vector<1x64xf32>
    %cst_75 = arith.constant dense<0.000000e+00> : vector<1x64xf32>
    %90 = tpu.matmul %88, %57, %cst_75 {dimension_numbers = #tpu.dot_dimension_numbers<[1], [0], [0], [1], [0, 0, 1, 1], [], []>} : vector<1x8xf32>, vector<8x64xf32>, vector<1x64xf32> -> vector<1x64xf32>
    %91 = vector.broadcast %89 : vector<1x64xf32> to vector<8x64xf32>
    %92 = arith.mulf %48, %91 : vector<8x64xf32>
    %93 = vector.broadcast %90 : vector<1x64xf32> to vector<8x64xf32>
    %94 = arith.addf %92, %93 : vector<8x64xf32>
    %cst_76 = arith.constant 0.000000e+00 : f32
    %95 = vector.broadcast %cst_76 : f32 to vector<8x64xf32>
    %96 = arith.maximumf %94, %95 : vector<8x64xf32>
    %97 = vector.broadcast %89 : vector<1x64xf32> to vector<8x64xf32>
    %98 = arith.mulf %55, %97 : vector<8x64xf32>
    %99 = vector.broadcast %90 : vector<1x64xf32> to vector<8x64xf32>
    %100 = arith.addf %98, %99 : vector<8x64xf32>
    %cst_77 = arith.constant 0.000000e+00 : f32
    %101 = vector.broadcast %cst_77 : f32 to vector<8x64xf32>
    %102 = arith.maximumf %100, %101 : vector<8x64xf32>
    %c0_78 = arith.constant 0 : index
    %c0_79 = arith.constant 0 : index
    %103 = vector.load %arg9[%c0_78, %c0_79] : memref<20x8xf32, #tpu.memory_space<vmem>>, vector<20x8xf32>
    %cst_80 = arith.constant dense<0.000000e+00> : vector<20x64xf32>
    %104 = tpu.matmul %103, %96, %cst_80 {dimension_numbers = #tpu.dot_dimension_numbers<[1], [0], [0], [1], [0, 0, 1, 1], [], []>} : vector<20x8xf32>, vector<8x64xf32>, vector<20x64xf32> -> vector<20x64xf32>
    %c0_81 = arith.constant 0 : index
    %c0_82 = arith.constant 0 : index
    %105 = vector.load %arg10[%c0_81, %c0_82] : memref<20x8xf32, #tpu.memory_space<vmem>>, vector<20x8xf32>
    %cst_83 = arith.constant dense<0.000000e+00> : vector<20x64xf32>
    %106 = tpu.matmul %105, %102, %cst_83 {dimension_numbers = #tpu.dot_dimension_numbers<[1], [0], [0], [1], [0, 0, 1, 1], [], []>} : vector<20x8xf32>, vector<8x64xf32>, vector<20x64xf32> -> vector<20x64xf32>
    %107 = arith.addf %104, %106 : vector<20x64xf32>
    %c0_84 = arith.constant 0 : index
    %c0_85 = arith.constant 0 : index
    %108 = vector.load %arg13[%c0_84, %c0_85] : memref<20x64xf32, #tpu.memory_space<vmem>>, vector<20x64xf32>
    tpu.vector_store %arg13[%c0_84, %c0_85], %107 {strides = array<i32>} : memref<20x64xf32, #tpu.memory_space<vmem>>, vector<20x64xf32>,
    %c0_86 = arith.constant 0 : index
    %c0_87 = arith.constant 0 : index
    %109 = vector.load %arg13[%c0_86, %c0_87] : memref<20x64xf32, #tpu.memory_space<vmem>>, vector<16x64xf32>
    %110 = arith.truncf %109 : vector<16x64xf32> to vector<16x64xbf16>
    %c2_88 = arith.constant 2 : index
    %c0_89 = arith.constant 0 : index
    %111 = vector.load %arg13[%c2_88, %c0_89] : memref<20x64xf32, #tpu.memory_space<vmem>>, vector<16x64xf32>
    %112 = arith.truncf %111 : vector<16x64xf32> to vector<16x64xbf16>
    %c4_90 = arith.constant 4 : index
    %c0_91 = arith.constant 0 : index
    %113 = vector.load %arg13[%c4_90, %c0_91] : memref<20x64xf32, #tpu.memory_space<vmem>>, vector<16x64xf32>
    %114 = arith.truncf %113 : vector<16x64xf32> to vector<16x64xbf16>
    %c0_92 = arith.constant 0 : index
    %c0_93 = arith.constant 0 : index
    %c0_94 = arith.constant 0 : index
    %115 = vector.load %arg8[%c0_92, %c0_93, %c0_94] : memref<4x64x48xbf16, #tpu.memory_space<vmem>>, vector<1x64x48xbf16>
    %116 = vector.shape_cast %115 : vector<1x64x48xbf16> to vector<64x48xbf16>
    %cst_95 = arith.constant dense<0.000000e+00> : vector<16x48xf32>
    %117 = tpu.matmul %110, %116, %cst_95 {dimension_numbers = #tpu.dot_dimension_numbers<[1], [0], [0], [1], [0, 0, 1, 1], [], []>} : vector<16x64xbf16>, vector<64x48xbf16>, vector<16x48xf32> -> vector<16x48xf32>
    %c1_96 = arith.constant 1 : index
    %c0_97 = arith.constant 0 : index
    %c0_98 = arith.constant 0 : index
    %118 = vector.load %arg8[%c1_96, %c0_97, %c0_98] : memref<4x64x48xbf16, #tpu.memory_space<vmem>>, vector<1x64x48xbf16>
    %119 = vector.shape_cast %118 : vector<1x64x48xbf16> to vector<64x48xbf16>
    %cst_99 = arith.constant dense<0.000000e+00> : vector<16x48xf32>
    %120 = tpu.matmul %112, %119, %cst_99 {dimension_numbers = #tpu.dot_dimension_numbers<[1], [0], [0], [1], [0, 0, 1, 1], [], []>} : vector<16x64xbf16>, vector<64x48xbf16>, vector<16x48xf32> -> vector<16x48xf32>
    %121 = arith.addf %117, %120 : vector<16x48xf32>
    %c2_100 = arith.constant 2 : index
    %c0_101 = arith.constant 0 : index
    %c0_102 = arith.constant 0 : index
    %122 = vector.load %arg8[%c2_100, %c0_101, %c0_102] : memref<4x64x48xbf16, #tpu.memory_space<vmem>>, vector<1x64x48xbf16>
    %123 = vector.shape_cast %122 : vector<1x64x48xbf16> to vector<64x48xbf16>
    %cst_103 = arith.constant dense<0.000000e+00> : vector<16x48xf32>
    %124 = tpu.matmul %112, %123, %cst_103 {dimension_numbers = #tpu.dot_dimension_numbers<[1], [0], [0], [1], [0, 0, 1, 1], [], []>} : vector<16x64xbf16>, vector<64x48xbf16>, vector<16x48xf32> -> vector<16x48xf32>
    %c3_104 = arith.constant 3 : index
    %c0_105 = arith.constant 0 : index
    %c0_106 = arith.constant 0 : index
    %125 = vector.load %arg8[%c3_104, %c0_105, %c0_106] : memref<4x64x48xbf16, #tpu.memory_space<vmem>>, vector<1x64x48xbf16>
    %126 = vector.shape_cast %125 : vector<1x64x48xbf16> to vector<64x48xbf16>
    %cst_107 = arith.constant dense<0.000000e+00> : vector<16x48xf32>
    %127 = tpu.matmul %114, %126, %cst_107 {dimension_numbers = #tpu.dot_dimension_numbers<[1], [0], [0], [1], [0, 0, 1, 1], [], []>} : vector<16x64xbf16>, vector<64x48xbf16>, vector<16x48xf32> -> vector<16x48xf32>
    %128 = arith.addf %124, %127 : vector<16x48xf32>
    %129 = math.tanh %121 : vector<16x48xf32>
    %c0_108 = arith.constant 0 : index
    %c0_109 = arith.constant 0 : index
    %130 = vector.load %arg11[%c0_108, %c0_109] : memref<32x48xf32, #tpu.memory_space<vmem>>, vector<16x48xf32>
    tpu.vector_store %arg11[%c0_108, %c0_109], %129 {strides = array<i32>} : memref<32x48xf32, #tpu.memory_space<vmem>>, vector<16x48xf32>,
    %131 = math.tanh %128 : vector<16x48xf32>
    %c16 = arith.constant 16 : index
    %c0_110 = arith.constant 0 : index
    %132 = vector.load %arg11[%c16, %c0_110] : memref<32x48xf32, #tpu.memory_space<vmem>>, vector<16x48xf32>
    tpu.vector_store %arg11[%c16, %c0_110], %131 {strides = array<i32>} : memref<32x48xf32, #tpu.memory_space<vmem>>, vector<16x48xf32>,
    return
  }
}

</mosaic_0001>

<bundles_post_ra>
// kernel: a_call__.1
= control target key start
LH: loop header
LB: loop body
LE: loop exit
PB: predicated region body
PF: predicated region fallthrough
CT: control target
= control target key end

     0   :  { %16 = vsyncpa [#allocation5], 0  ;;  %s2619_s0 = inlined_call_operand.vmem [shape: bf16[2,32], index: 0, kind: input, shape index: {}]   ;;  %s2620_s1 = inlined_call_operand.hbm [shape: bf16[4,32,64], index: 1, kind: input, shape index: {}]   ;;  %s2621_s2 = inlined_call_operand.vmem [shape: f32[4,1,64], index: 2, kind: input, shape index: {}]   ;;  %s2622_s3 = inlined_call_operand.hbm [shape: bf16[4,64,64], index: 3, kind: input, shape index: {}]   ;;  %s2623_s4 = inlined_call_operand.hbm [shape: f32[64,8], index: 4, kind: input, shape index: {}]   ;;  %s2624_s5 = inlined_call_operand.vmem [shape: f32[8,64], index: 5, kind: input, shape index: {}]   ;;  %s2625_s6 = inlined_call_operand.vmem [shape: f32[1,8], index: 6, kind: input, shape index: {}]   ;;  %s2626_s7 = inlined_call_operand.vmem [shape: f32[1,8], index: 7, kind: input, shape index: {}]   ;;  %s2627_s8 = inlined_call_operand.hbm [shape: bf16[4,64,48], index: 8, kind: input, shape index: {}]   ;;  %s2628_s9 = inlined_call_operand.hbm [shape: f32[20,8], index: 9, kind: input, shape index: {}]   ;;  %s2629_s10 = inlined_call_operand.hbm [shape: f32[20,8], index: 10, kind: input, shape index: {}]   ;;  %s2630_s11 = inlined_call_operand.vmem [shape: f32[32,48], index: 11, kind: output, shape index: {}]  }
   0x1   :  { %17 = vsyncpa [#allocation7], 0 }
   0x2   :  { %18 = vsyncpa [#allocation10], 0 }
   0x3   :  { %19 = vsyncpa [#allocation13], 0  ;;  %s2256_s17 = smov [#allocation6]   ;;  %s2257_s19 = smov [#allocation9]  }
   0x4   :  { %s41_s18 = sshll.u32 %s2256_s17, 4  ;;  %s71_s20 = sshll.u32 %s2257_s19, 4  ;;  %s42_s18 = int_to_ptr.vmem [resolvable:$true] %s41_s18  ;;  %s2329_s20 = int_to_ptr.vmem [resolvable:$true] %s71_s20 }
   0x5   :  { %s2116_s23 = scalar_lea.hbm %s2622_s3, 2048 }
   0x6   :  { %p2117_p0 = scmp.ne.s32.totalorder %s2622_s3, %s2116_s23  ;;  %p2120_p1 = scmp.lt.u32.totalorder %s2116_s23, %s2622_s3 }
   0x8   :  { %p2122_p2 = pnand %p2120_p1, %p2117_p0 }
   0xa   :  { %2125 = shalt.err (!%p2122_p2)
}
   0xb   :  { %s2126_s28 = scalar_lea.vmem %s42_s18, 2048  ;;  %p2131_p4 = scmp.lt.s32.totalorder %s42_s18, %s42_s18 }
   0xc   :  { %p2127_p3 = scmp.ne.s32.totalorder %s42_s18, %s2126_s28  ;;  %p2132_p5 = scmp.lt.s32.totalorder %s2126_s28, %s2126_s28 }
   0xe   :  { %p2133_p6 = por %p2132_p5, %p2131_p4 }
  0x10   :  { %p2134_p7 = pnand %p2133_p6, %p2127_p3 }
  0x12   :  { %2137 = shalt.err (!%p2134_p7)
}
  0x13   :  { %s2258_s29 = smov 64   ;;  %s2259_s30 = smov 4  }
  0x14   :  { %47 = dma.hbm_to_vmem [thread:$0]  %s2622_s3, 2048, %s42_s18, [#allocation7], %s2258_s29, %s2258_s29, %s2259_s30  }
  0x15   :  { %s2138_s16 = scalar_lea.hbm %s2627_s8, 2048 }
  0x16   :  { %p2139_p8 = scmp.ne.s32.totalorder %s2627_s8, %s2138_s16  ;;  %p2142_p9 = scmp.lt.u32.totalorder %s2138_s16, %s2627_s8 }
  0x18   :  { %p2144_p10 = pnand %p2142_p9, %p2139_p8 }
  0x1a   :  { %2147 = shalt.err (!%p2144_p10)
}
  0x1b   :  { %s2148_s23 = scalar_lea.vmem %s2329_s20, 2048  ;;  %p2153_p12 = scmp.lt.s32.totalorder %s2329_s20, %s2329_s20 }
  0x1c   :  { %p2149_p11 = scmp.ne.s32.totalorder %s2329_s20, %s2148_s23  ;;  %p2154_p13 = scmp.lt.s32.totalorder %s2148_s23, %s2148_s23 }
  0x1e   :  { %p2155_p0 = por %p2154_p13, %p2153_p12 }
  0x20   :  { %p2156_p1 = pnand %p2155_p0, %p2149_p11 }
  0x22   :  { %2159 = shalt.err (!%p2156_p1)
}
  0x23   :  { %77 = dma.hbm_to_vmem [thread:$0]  %s2627_s8, 2048, %s2329_s20, [#allocation10], %s2258_s29, %s2258_s29, %s2259_s30  }
  0x24   :  { %s2260_s24 = smov [#allocation4]   ;;  %s2261_s26 = smov [#allocation8]  }
  0x25   :  { %s27_s25 = sshll.u32 %s2260_s24, 4  ;;  %s53_s27 = sshll.u32 %s2261_s26, 4  ;;  %s28_s25 = int_to_ptr.vmem [resolvable:$true] %s27_s25  ;;  %s2366_s27 = int_to_ptr.vmem [resolvable:$true] %s53_s27 }
  0x26   :  { %s2160_s13 = scalar_lea.hbm %s2620_s1, 1024 }
  0x27   :  { %p2161_p2 = scmp.ne.s32.totalorder %s2620_s1, %s2160_s13  ;;  %p2164_p3 = scmp.lt.u32.totalorder %s2160_s13, %s2620_s1 }
  0x29   :  { %p2166_p4 = pnand %p2164_p3, %p2161_p2 }
  0x2b   :  { %2169 = shalt.err (!%p2166_p4)
}
  0x2c   :  { %s2170_s8 = scalar_lea.vmem %s28_s25, 1024  ;;  %p2175_p6 = scmp.lt.s32.totalorder %s28_s25, %s28_s25 }
  0x2d   :  { %p2171_p5 = scmp.ne.s32.totalorder %s28_s25, %s2170_s8  ;;  %p2176_p7 = scmp.lt.s32.totalorder %s2170_s8, %s2170_s8 }
  0x2f   :  { %p2177_p8 = por %p2176_p7, %p2175_p6 }
  0x31   :  { %p2178_p9 = pnand %p2177_p8, %p2171_p5 }
  0x33   :  { %2181 = shalt.err (!%p2178_p9)
}
  0x34   :  { %33 = dma.hbm_to_vmem [thread:$0]  %s2620_s1, 1024, %s28_s25, [#allocation5], %s2258_s29, %s2258_s29, %s2259_s30  }
  0x35   :  { %s2182_s23 = scalar_lea.hbm %s2623_s4, 1024 }
  0x36   :  { %p2183_p10 = scmp.ne.s32.totalorder %s2623_s4, %s2182_s23  ;;  %p2186_p11 = scmp.lt.u32.totalorder %s2182_s23, %s2623_s4 }
  0x38   :  { %p2188_p12 = pnand %p2186_p11, %p2183_p10 }
  0x3a   :  { %2191 = shalt.err (!%p2188_p12)
}
  0x3b   :  { %s2192_s28 = scalar_lea.vmem %s2366_s27, 1024  ;;  %p2197_p0 = scmp.lt.s32.totalorder %s2366_s27, %s2366_s27 }
  0x3c   :  { %p2193_p13 = scmp.ne.s32.totalorder %s2366_s27, %s2192_s28  ;;  %p2198_p1 = scmp.lt.s32.totalorder %s2192_s28, %s2192_s28 }
  0x3e   :  { %p2199_p2 = por %p2198_p1, %p2197_p0 }
  0x40   :  { %p2200_p3 = pnand %p2199_p2, %p2193_p13 }
  0x42   :  { %2203 = shalt.err (!%p2200_p3)
}
  0x43   :  { %s2262_s1 = smov 128   ;;  %s2263_s29 = smov 8  }
  0x44   :  { %59 = dma.hbm_to_vmem [thread:$0]  %s2623_s4, 1024, %s2366_s27, [#allocation7], %s2262_s1, %s2262_s1, %s2263_s29  }
  0x45   :  { %s2264_s12 = smov [#allocation11]   ;;  %s2265_s14 = smov [#allocation12]  }
  0x46   :  { %s83_s13 = sshll.u32 %s2264_s12, 4  ;;  %s95_s15 = sshll.u32 %s2265_s14, 4  ;;  %s84_s13 = int_to_ptr.vmem [resolvable:$true] %s83_s13  ;;  %s2403_s15 = int_to_ptr.vmem [resolvable:$true] %s95_s15 }
  0x47   :  { %s2204_s8 = scalar_lea.hbm %s2628_s9, 384 }
  0x48   :  { %p2205_p4 = scmp.ne.s32.totalorder %s2628_s9, %s2204_s8  ;;  %p2208_p5 = scmp.lt.u32.totalorder %s2204_s8, %s2628_s9 }
  0x4a   :  { %p2210_p6 = pnand %p2208_p5, %p2205_p4 }
  0x4c   :  { %2213 = shalt.err (!%p2210_p6)
}
  0x4d   :  { %s2214_s4 = scalar_lea.vmem %s84_s13, 384  ;;  %p2219_p8 = scmp.lt.s32.totalorder %s84_s13, %s84_s13 }
  0x4e   :  { %p2215_p7 = scmp.ne.s32.totalorder %s84_s13, %s2214_s4  ;;  %p2220_p9 = scmp.lt.s32.totalorder %s2214_s4, %s2214_s4 }
  0x50   :  { %p2221_p10 = por %p2220_p9, %p2219_p8 }
  0x52   :  { %p2222_p11 = pnand %p2221_p10, %p2215_p7 }
  0x54   :  { %2225 = shalt.err (!%p2222_p11)
}
  0x55   :  { %89 = dma.hbm_to_vmem [thread:$0]  %s2628_s9, 384, %s84_s13, [#allocation10], %s2262_s1, %s2262_s1, %s2263_s29  }
  0x56   :  { %s2226_s24 = scalar_lea.hbm %s2629_s10, 384 }
  0x57   :  { %p2227_p12 = scmp.ne.s32.totalorder %s2629_s10, %s2226_s24  ;;  %p2230_p13 = scmp.lt.u32.totalorder %s2226_s24, %s2629_s10 }
  0x59   :  { %p2232_p0 = pnand %p2230_p13, %p2227_p12 }
  0x5b   :  { %2235 = shalt.err (!%p2232_p0)
}
  0x5c   :  { %s2236_s12 = scalar_lea.vmem %s2403_s15, 384  ;;  %p2241_p2 = scmp.lt.s32.totalorder %s2403_s15, %s2403_s15 }
  0x5d   :  { %p2237_p1 = scmp.ne.s32.totalorder %s2403_s15, %s2236_s12  ;;  %p2242_p3 = scmp.lt.s32.totalorder %s2236_s12, %s2236_s12 }
  0x5f   :  { %p2243_p4 = por %p2242_p3, %p2241_p2 }
  0x61   :  { %p2244_p5 = pnand %p2243_p4, %p2237_p1 }
  0x63   :  { %2247 = shalt.err (!%p2244_p5)
}
  0x64   :  { %101 = dma.hbm_to_vmem [thread:$0]  %s2629_s10, 384, %s2403_s15, [#allocation13], %s2262_s1, %s2262_s1, %s2263_s29  }
  0x65   :  { %2248 = dma.done.wait [#allocation5], 1024  }
  0x66   :  { %2249 = vsyncadd [#allocation5], 4294966272 }
  0x67   :  { %2250 = dma.done.wait [#allocation7], 3072  }
  0x68   :  { %2251 = vsyncadd [#allocation7], 4294964224 }
  0x69   :  { %2252 = dma.done.wait [#allocation10], 2432  }
  0x6a   :  { %2253 = vsyncadd [#allocation10], 4294964864 }
  0x6b   :  { %2254 = dma.done.wait [#allocation13], 384  }
  0x6c   :  { %2255 = vsyncadd [#allocation13], 4294966912  ;;  %vm122_vm0 = vcmask 517120   ;;  %v2266_v0 = vmov 0.0   ;;  %vm2267_vm1 = vmmov 0   ;;  %v2066_v1 = vld [vmem:[#allocation4] sm:$0xff]  }
  0x6d   :  { %1807 = vmatprep.subr.bf16.mxu0 %v2266_v0  ;;  %1815 = vmatprep.subr.bf16.mxu1 %v2266_v0  ;;  %123 = vst.msk [vmem:[#allocation2] sm:$0x3] %vm122_vm0, %v2266_v0  ;;  %124 = vst.msk [vmem:[#allocation2 + $0xa] sm:$0x3] %vm122_vm0, %v2266_v0  ;;  %v2067_v2 = vld [vmem:[#allocation4 + $0x10] sm:$0xff]   ;;  %v2068_v3 = vld [vmem:[#allocation4 + $0x8] sm:$0xff]  }
  0x6e   :  { %1811 = vmatprep.mubr.msk.bf16.mxu0 %vm2267_vm1, %v2266_v0  ;;  %1819 = vmatprep.mubr.msk.bf16.mxu1 %vm2267_vm1, %v2266_v0  ;;  %v2069_v4 = vld [vmem:[#allocation4 + $0x18] sm:$0xff]   ;;  %vm148_vm2 = vcmask 261120   ;;  %v2070_v6 = vld [vmem:[#allocation4 + $0x20] sm:$0xff]   ;;  %v2071_v7 = vld [vmem:[#allocation4 + $0x30] sm:$0xff]   ;;  %vm438_vm3 = vcmask 523264   ;;  %v2268_v59 = vmov 0.0|0.0  }
  0x6f   :  { %1808 = vmatpush3.bf16.msra.mxu0 %v2066_v1  ;;  %1816 = vmatpush3.bf16.msra.mxu1 %v2067_v2  ;;  %v121_v5 = vld [vmem:[%s2619_s0] sm:$0x1]  ;;  %v2072_v8 = vld [vmem:[#allocation4 + $0x28] sm:$0xff]   ;;  %v2074_v10 = vld [vmem:[#allocation6 + $0x20] sm:$0xff]   ;;  %vm797_vm4 = vcmask 64512   ;;  %vm1321_vm5 = vcmask 519168  }
  0x70   :  { %1809 = vmatprep.subr.bf16.mxu0 %v2266_v0  ;;  %1817 = vmatprep.subr.bf16.mxu1 %v2266_v0  ;;  %v2073_v9 = vld [vmem:[#allocation4 + $0x38] sm:$0xff]   ;;  %v2075_v11 = vld [vmem:[#allocation6 + $0x60] sm:$0xff]   ;;  %v2076_v12 = vld [vmem:[#allocation6 + $0x28] sm:$0xff]   ;;  %vm1638_vm6 = vcmask 392192  }
  0x71   :  { %v2077_v13 = vld [vmem:[#allocation6 + $0x68] sm:$0xff]   ;;  %v2078_v14 = vld [vmem:[#allocation6 + $0x30] sm:$0xff]   ;;  %v2080_v16 = vld [vmem:[#allocation6 + $0x38] sm:$0xff]  }
  0x72   :  { %v2079_v15 = vld [vmem:[#allocation6 + $0x70] sm:$0xff]   ;;  %v2081_v17 = vld [vmem:[#allocation6 + $0x78] sm:$0xff]   ;;  %v2082_v42 = vld [vmem:[#allocation6] sm:$0xff]  }
  0x73   :  { %1810 = vmatpush3.bf16.msra.mxu0 %v2068_v3  ;;  %1818 = vmatpush3.bf16.msra.mxu1 %v2069_v4  ;;  %v1653_v18 = vld [vmem:[%s2621_s2] ss:$0 sm:$0xff]  ;;  %v1658_v19 = vld [vmem:[%s2621_s2 + $0x1] ss:$0 sm:$0xff]  ;;  %v1663_v30 = vld [vmem:[%s2621_s2 + $0x2] ss:$0 sm:$0xff] }
  0x74   :  { %1823 = vmatprep.subr.bf16.mxu0 %v2266_v0  ;;  %1831 = vmatprep.subr.bf16.mxu1 %v2266_v0  ;;  %v1668_v31 = vld [vmem:[%s2621_s2 + $0x3] ss:$0 sm:$0xff]  ;;  %v2083_v45 = vld [vmem:[#allocation6 + $0x40] sm:$0xff]   ;;  %v2084_v48 = vld [vmem:[#allocation6 + $0x8] sm:$0xff]  }
  0x75   :  { %v2085_v49 = vld [vmem:[#allocation6 + $0x48] sm:$0xff]   ;;  %v2086_v50 = vld [vmem:[#allocation6 + $0x10] sm:$0xff]   ;;  %v2088_v52 = vld [vmem:[#allocation6 + $0x18] sm:$0xff]  }
  0x76   :  { %1812 = vmatmul.mubr.msk.bf16.vlgmr.msra.gmra.mrb[0].mxu0 %vm148_vm2, %v121_v5  ;;  %1820 = vmatmul.mubr.msk.bf16.vlgmr.msra.gmra.mrb[0].mxu1 %vm148_vm2, %v121_v5  ;;  %v2087_v51 = vld [vmem:[#allocation6 + $0x50] sm:$0xff]   ;;  %v2089_v53 = vld [vmem:[#allocation6 + $0x58] sm:$0xff]   ;;  %v698_v56 = vld [vmem:[#allocation8] sm:$0xff] }
  0x77   :  { %1824 = vmatpush3.bf16.msra.mxu0 %v2070_v6  ;;  %1832 = vmatpush3.bf16.msra.mxu1 %v2071_v7  ;;  %v699_v57 = vld [vmem:[#allocation8 + $0x8] sm:$0xff]  ;;  %v700_v60 = vld [vmem:[#allocation8 + $0x10] sm:$0xff]  ;;  %v701_v61 = vld [vmem:[#allocation8 + $0x18] sm:$0xff] }
  0x78   :  { %1825 = vmatprep.subr.bf16.mxu0 %v2266_v0  ;;  %1833 = vmatprep.subr.bf16.mxu1 %v2266_v0  ;;  %v2011_v58 = vpack.c.bf16 %v699_v57, %v698_v56  ;;  %v2014_v62 = vpack.c.bf16 %v701_v61, %v700_v60  ;;  %v702_v63 = vld [vmem:[#allocation8 + $0x20] sm:$0xff]  ;;  %v703_v1 = vld [vmem:[#allocation8 + $0x28] sm:$0xff]  ;;  %v704_v3 = vld [vmem:[#allocation8 + $0x30] sm:$0xff] }
  0x79   :  { %1827 = vmatprep.mubr.msk.bf16.mxu0 %vm2267_vm1, %v2266_v0  ;;  %1835 = vmatprep.mubr.msk.bf16.mxu1 %vm2267_vm1, %v2266_v0  ;;  %v2017_v2 = vpack.c.bf16 %v703_v1, %v702_v63  ;;  %v705_v4 = vld [vmem:[#allocation8 + $0x38] sm:$0xff] }
  0x7a   :  { %v2520_v6 = vld [vmem:[%s2624_s5] sm:$0xff] }
  0x7b   :  { %1826 = vmatpush3.bf16.msra.mxu0 %v2072_v8  ;;  %1834 = vmatpush3.bf16.msra.mxu1 %v2073_v9 }
  0x7c   :  { %1839 = vmatprep.subr.bf16.mxu0 %v2266_v0  ;;  %1863 = vmatprep.subr.bf16.mxu1 %v2266_v0 }
  0x7e   :  { %1828 = vmatmul.mubr.msk.bf16.vlgmr.msra.gmra.mrb[4].mxu0 %vm148_vm2, %v121_v5  ;;  %1836 = vmatmul.mubr.msk.bf16.vlgmr.msra.gmra.mrb[4].mxu1 %vm148_vm2, %v121_v5  ;;  %v2020_v5 = vpack.c.bf16 %v705_v4, %v704_v3 }
  0x7f   :  { %1847 = vmatprep.mubr.msk.bf16.mxu0 %vm2267_vm1, %v2266_v0  ;;  %1871 = vmatprep.mubr.msk.bf16.mxu1 %vm2267_vm1, %v2266_v0 }
  0x80   :  { %1840 = vmatpush3.bf16.msra.mxu0 %v2074_v10  ;;  %1864 = vmatpush3.bf16.msra.mxu1 %v2075_v11 }
  0x81   :  { %1841 = vmatprep.subr.bf16.mxu0 %v2266_v0  ;;  %1865 = vmatprep.subr.bf16.mxu1 %v2266_v0 }
  0x84   :  { %1842 = vmatpush3.bf16.msra.mxu0 %v2076_v12  ;;  %1866 = vmatpush3.bf16.msra.mxu1 %v2077_v13 }
  0x85   :  { %1843 = vmatprep.subr.bf16.mxu0 %v2266_v0  ;;  %1867 = vmatprep.subr.bf16.mxu1 %v2266_v0 }
  0x88   :  { %1844 = vmatpush3.bf16.msra.mxu0 %v2078_v14  ;;  %1868 = vmatpush3.bf16.msra.mxu1 %v2079_v15 }
  0x89   :  { %1845 = vmatprep.subr.bf16.mxu0 %v2266_v0  ;;  %1869 = vmatprep.subr.bf16.mxu1 %v2266_v0 }
  0x8c   :  { %1846 = vmatpush3.bf16.msra.mxu0 %v2080_v16  ;;  %1870 = vmatpush3.bf16.msra.mxu1 %v2081_v17 }
  0x8d   :  { %1851 = vmatprep.subr.bf16.mxu0 %v2266_v0  ;;  %1875 = vmatprep.subr.bf16.mxu1 %v2266_v0 }
 0x149   :  { %v186_v20 = vpop.f32.mrb[0].mxu0  ;;  %v252_v22 = vpop.f32.mrb[0].mxu1 }
 0x14a   :  { %v187_v21 = vadd.f32 %v1653_v18, %v186_v20  ;;  %v1813_v23 = vpop.f32.mrb[1].mxu0  ;;  %v253_v24 = vadd.f32 %v1658_v19, %v252_v22  ;;  %v1821_v25 = vpop.f32.mrb[1].mxu1 }
 0x14b   :  { %v189_v26 = vpop.f32.mrb[2].mxu0  ;;  %v255_v27 = vpop.f32.mrb[2].mxu1 }
 0x14c   :  { %192 = vst.msk [vmem:[#allocation2 + $0x2] sm:$0x3] %vm122_vm0, %v187_v21  ;;  %v1814_v28 = vpop.f32.mrb[3].mxu0  ;;  %258 = vst.msk [vmem:[#allocation2 + $0x4] sm:$0x3] %vm122_vm0, %v253_v24  ;;  %v1822_v29 = vpop.f32.mrb[3].mxu1 }
 0x151   :  { %v318_v32 = vpop.f32.mrb[4].mxu0  ;;  %v384_v34 = vpop.f32.mrb[4].mxu1 }
 0x152   :  { %v319_v33 = vadd.f32 %v1663_v30, %v318_v32  ;;  %v1829_v35 = vpop.f32.mrb[5].mxu0  ;;  %v385_v36 = vadd.f32 %v1668_v31, %v384_v34  ;;  %v1837_v37 = vpop.f32.mrb[5].mxu1 }
 0x153   :  { %v321_v38 = vpop.f32.mrb[6].mxu0  ;;  %v387_v39 = vpop.f32.mrb[6].mxu1 }
 0x154   :  { %324 = vst.msk [vmem:[#allocation2 + $0x6] sm:$0x3] %vm122_vm0, %v319_v33  ;;  %v1830_v40 = vpop.f32.mrb[7].mxu0  ;;  %390 = vst.msk [vmem:[#allocation2 + $0x8] sm:$0x3] %vm122_vm0, %v385_v36  ;;  %v1838_v41 = vpop.f32.mrb[7].mxu1  ;;  %v871_v33 = vlaneseq }
 0x156   :  { %v872_v34 = vshrl.u32 %v871_v33, 7 }
 0x158   :  { %v873_v35 = vsub.s32 0, %v872_v34 }
 0x15b   :  { %v393_v43 = vld [vmem:[#allocation2 + $0x2] sm:$0xff] }
 0x15c   :  { %v395_v44 = vld [vmem:[#allocation2 + $0x4] sm:$0xff]  ;;  %v394_v46 = vpack.c.bf16 %v393_v43, %v393_v43 }
 0x15d   :  { %v396_v47 = vpack.c.bf16 %v395_v44, %v395_v44  ;;  %v391_v54 = vld [vmem:[#allocation2] sm:$0xff] }
 0x15e   :  { %1848 = vmatmul.mubr.msk.bf16.vlgmr.msra.gmra.mrb[8].mxu0 %vm438_vm3, %v394_v46  ;;  %v392_v55 = vpack.c.bf16 %v391_v54, %v391_v54 }
 0x15f   :  { %1872 = vmatmul.mubr.msk.bf16.vlgmr.msra.gmra.mrb[8].mxu1 %vm438_vm3, %v396_v47  ;;  %1852 = vmatpush3.bf16.msra.mxu0 %v2082_v42 }
 0x160   :  { %1876 = vmatpush3.bf16.msra.mxu1 %v2083_v45  ;;  %1853 = vmatprep.subr.bf16.mxu0 %v2266_v0 }
 0x161   :  { %1877 = vmatprep.subr.bf16.mxu1 %v2266_v0  ;;  %1859 = vmatprep.mubr.msk.bf16.mxu0 %vm2267_vm1, %v2266_v0 }
 0x162   :  { %1883 = vmatprep.mubr.msk.bf16.mxu1 %vm2267_vm1, %v2266_v0 }
 0x163   :  { %1854 = vmatpush3.bf16.msra.mxu0 %v2084_v48 }
 0x164   :  { %1878 = vmatpush3.bf16.msra.mxu1 %v2085_v49  ;;  %1855 = vmatprep.subr.bf16.mxu0 %v2266_v0 }
 0x165   :  { %1879 = vmatprep.subr.bf16.mxu1 %v2266_v0 }
 0x167   :  { %1856 = vmatpush3.bf16.msra.mxu0 %v2086_v50 }
 0x168   :  { %1880 = vmatpush3.bf16.msra.mxu1 %v2087_v51  ;;  %1857 = vmatprep.subr.bf16.mxu0 %v2266_v0 }
 0x169   :  { %1881 = vmatprep.subr.bf16.mxu1 %v2266_v0 }
 0x16b   :  { %1858 = vmatpush3.bf16.msra.mxu0 %v2088_v52 }
 0x16c   :  { %1882 = vmatpush3.bf16.msra.mxu1 %v2089_v53  ;;  %2010 = vmatprep.subr.bf16.mxu0 %v2268_v59 }
 0x16d   :  { %1906 = vmatprep.subr.mxu1 %v2266_v0 }
 0x16e   :  { %1860 = vmatmul.mubr.msk.bf16.vlgmr.msra.gmra.mrb[8].mxu0 %vm438_vm3, %v392_v55 }
 0x16f   :  { %1884 = vmatmul.mubr.msk.bf16.vlgmr.msra.gmra.mrb[8].mxu1 %vm438_vm3, %v394_v46  ;;  %1903 = vmatprep.mubr.msk.f32.mxu0 %vm2267_vm1, %v2266_v0 }
 0x170   :  { %1908 = vmatprep.mubr.msk.f32.mxu1 %vm2267_vm1, %v2266_v0  ;;  %2012 = vmatpush3.bf16.msra.mxu0 %v2011_v58 }
 0x171   :  { %2013 = vmatprep.subr.bf16.mxu0 %v2268_v59  ;;  %1907 = vmatpush3.msra.mxu1 %v2520_v6 }
 0x172   :  { %2022 = vmatprep.subr.bf16.mxu1 %v2268_v59 }
 0x174   :  { %2015 = vmatpush3.bf16.msra.mxu0 %v2014_v62 }
 0x175   :  { %2016 = vmatprep.subr.bf16.mxu0 %v2268_v59 }
 0x178   :  { %2018 = vmatpush3.bf16.msra.mxu0 %v2017_v2 }
 0x179   :  { %2019 = vmatprep.subr.bf16.mxu0 %v2268_v59 }
 0x17c   :  { %2021 = vmatpush3.bf16.msra.mxu0 %v2020_v5 }
 0x17d   :  { %1930 = vmatprep.subr.mxu0 %v2266_v0 }
 0x241   :  { %v2523_v7 = vpop.f32.mrb[8].mxu0 }
 0x242   :  { %v2525_v8 = vpop.f32.mrb[8].mxu1  ;;  %v707_v9 = vsel %vm438_vm3, %v2523_v7, 0.0  ;;  %v1861_v11 = vpop.f32.mrb[9].mxu0 }
 0x243   :  { %v714_v10 = vsel %vm438_vm3, %v2525_v8, 0.0  ;;  %v1885_v12 = vpop.f32.mrb[9].mxu1  ;;  %v708_v13 = vrot.slane %v707_v9, 4  ;;  %v546_v15 = vpop.f32.mrb[10].mxu0 }
 0x244   :  { %v715_v14 = vrot.slane %v714_v10, 4  ;;  %v695_v16 = vpop.f32.mrb[10].mxu1  ;;  %v1862_v17 = vpop.f32.mrb[11].mxu0 }
 0x245   :  { %v1886_v18 = vpop.f32.mrb[11].mxu1  ;;  %v709_v19 = vadd.f32 %v708_v13, %v707_v9 }
 0x246   :  { %v716_v20 = vadd.f32 %v715_v14, %v714_v10 }
 0x247   :  { %v710_v21 = vrot.slane %v709_v19, 2 }
 0x248   :  { %v717_v22 = vrot.slane %v716_v20, 2 }
 0x249   :  { %v711_v23 = vadd.f32 %v710_v21, %v709_v19  ;;  %v1138_v19 = vld [vmem:[#allocation12] sm:$0xff]  ;;  %v1140_v21 = vld [vmem:[#allocation12 + $0x10] sm:$0xf] }
 0x24a   :  { %v718_v24 = vadd.f32 %v717_v22, %v716_v20  ;;  %v1135_v20 = vld [vmem:[#allocation11] sm:$0xff]  ;;  %v1137_v22 = vld [vmem:[#allocation11 + $0x10] sm:$0xf] }
 0x24b   :  { %v712_v25 = vrot.slane %v711_v23, 1 }
 0x24c   :  { %v719_v26 = vrot.slane %v718_v24, 1 }
 0x24d   :  { %v713_v27 = vadd.f32 %v712_v25, %v711_v23  ;;  %v2090_v23 = vld [vmem:[#allocation9 + $0x20] sm:$0xff]   ;;  %v2092_v25 = vld [vmem:[#allocation9 + $0x28] sm:$0xff]  }
 0x24e   :  { %v720_v28 = vadd.f32 %v719_v26, %v718_v24  ;;  %v2091_v24 = vld [vmem:[#allocation9 + $0x60] sm:$0xff]   ;;  %v2093_v26 = vld [vmem:[#allocation9 + $0x68] sm:$0xff]  }
 0x250   :  { %v721_v29 = vadd.f32 %v720_v28, %v713_v27  ;;  %v2094_v27 = vld [vmem:[#allocation9 + $0x30] sm:$0xff]  }
 0x251   :  { %v2095_v28 = vld [vmem:[#allocation9 + $0x70] sm:$0xff]  }
 0x252   :  { %1904 = vmatmul.mubr.msk.f32.vlgmr.msra.gmra.mrb[12].mxu0 %vm438_vm3, %v721_v29  ;;  %v2096_v29 = vld [vmem:[#allocation9 + $0x38] sm:$0xff]  }
 0x253   :  { %1931 = vmatpush3.msra.mxu0 %v2520_v6  ;;  %1932 = vmatprep.mubr.msk.f32.mxu0 %vm2267_vm1, %v2266_v0 }
 0x254   :  { %1935 = vmatprep.subr.mxu0 %v2266_v0 }
 0x325   :  { %v791_v30 = vpop.f32.mrb[12].mxu0 }
 0x326   :  { %v796_v31 = vmul.f32 0.0078125, %v791_v30  ;;  %v1905_v32 = vpop.f32.mrb[13].mxu0  ;;  %v2097_v30 = vld [vmem:[#allocation9 + $0x78] sm:$0xff]  }
 0x328   :  { %1909 = vmatmul.mubr.msk.f32.vlgmr.msra.gmra.mrb[12].mxu1 %vm797_vm4, %v796_v31 }
 0x329   :  { %2024 = vmatpush3.bf16.msra.mxu1 %v2011_v58  ;;  %1927 = vmatprep.mubr.msk.f32.mxu1 %vm2267_vm1, %v2266_v0 }
 0x32a   :  { %2025 = vmatprep.subr.bf16.mxu1 %v2268_v59 }
 0x32d   :  { %2027 = vmatpush3.bf16.msra.mxu1 %v2014_v62  ;;  %v968_v62 = vld [vmem:[%s2625_s6] sm:$0x1] }
 0x32e   :  { %2028 = vmatprep.subr.bf16.mxu1 %v2268_v59 }
 0x331   :  { %2030 = vmatpush3.bf16.msra.mxu1 %v2017_v2  ;;  %v972_v2 = vld [vmem:[%s2626_s7] sm:$0x1] }
 0x332   :  { %2031 = vmatprep.subr.bf16.mxu1 %v2268_v59 }
 0x335   :  { %2033 = vmatpush3.bf16.msra.mxu1 %v2020_v5 }
 0x336   :  { %1940 = vmatprep.subr.mxu1 %v2266_v0 }
 0x3fb   :  { %v867_v36 = vpop.f32.mrb[12].mxu1 }
 0x3fc   :  { %v874_v37 = vrot.slane %v867_v36, %v873_v35  ;;  %v1910_v38 = vpop.f32.mrb[13].mxu1 }
 0x3fe   :  { %v875_v39 = vsub.f32 %v2523_v7, %v874_v37  ;;  %v876_v40 = vsub.f32 %v2525_v8, %v874_v37 }
 0x400   :  { %v877_v41 = vmul.f32 %v875_v39, %v875_v39  ;;  %v885_v42 = vmul.f32 %v876_v40, %v876_v40 }
 0x402   :  { %v878_v43 = vsel %vm438_vm3, %v877_v41, 0.0  ;;  %v886_v44 = vsel %vm438_vm3, %v885_v42, 0.0 }
 0x403   :  { %v879_v45 = vrot.slane %v878_v43, 4  ;;  %v887_v46 = vrot.slane %v886_v44, 4 }
 0x405   :  { %v880_v47 = vadd.f32 %v879_v45, %v878_v43  ;;  %v888_v48 = vadd.f32 %v887_v46, %v886_v44 }
 0x407   :  { %v881_v49 = vrot.slane %v880_v47, 2  ;;  %v889_v50 = vrot.slane %v888_v48, 2 }
 0x409   :  { %v882_v51 = vadd.f32 %v881_v49, %v880_v47  ;;  %v890_v52 = vadd.f32 %v889_v50, %v888_v48  ;;  %v2098_v47 = vld [vmem:[#allocation9] sm:$0xff]  }
 0x40a   :  { %v2099_v48 = vld [vmem:[#allocation9 + $0x40] sm:$0xff]  }
 0x40b   :  { %v883_v53 = vrot.slane %v882_v51, 1  ;;  %v891_v54 = vrot.slane %v890_v52, 1 }
 0x40d   :  { %v884_v55 = vadd.f32 %v883_v53, %v882_v51  ;;  %v892_v56 = vadd.f32 %v891_v54, %v890_v52  ;;  %v2100_v54 = vld [vmem:[#allocation9 + $0x8] sm:$0xff]  }
 0x40f   :  { %v893_v57 = vadd.f32 %v892_v56, %v884_v55  ;;  %v2101_v55 = vld [vmem:[#allocation9 + $0x48] sm:$0xff]   ;;  %v2102_v56 = vld [vmem:[#allocation9 + $0x10] sm:$0xff]  }
 0x411   :  { %1928 = vmatmul.mubr.msk.f32.vlgmr.msra.gmra.mrb[14].mxu1 %vm438_vm3, %v893_v57  ;;  %v2103_v57 = vld [vmem:[#allocation9 + $0x50] sm:$0xff]  }
 0x412   :  { %1942 = vmatprep.mubr.msk.f32.mxu1 %vm2267_vm1, %v2266_v0 }
 0x4e4   :  { %v963_v58 = vpop.f32.mrb[14].mxu1 }
 0x4e5   :  { %v967_v59 = vmul.f32 0.0078125, %v963_v58  ;;  %v1929_v60 = vpop.f32.mrb[15].mxu1  ;;  %v2104_v58 = vld [vmem:[#allocation9 + $0x18] sm:$0xff]  }
 0x4e7   :  { %v969_v61 = vadd.f32 1e-05, %v967_v59  ;;  %v2105_v59 = vld [vmem:[#allocation9 + $0x58] sm:$0xff]  }
 0x4e9   :  { %2106 = vrsqrt.f32 %v969_v61 }
 0x4f3   :  { %v2107_v63 = vpop.eup %2106 }
 0x4f4   :  { %v971_v1 = vmul.f32 %v2107_v63, %v968_v62 }
 0x4f6   :  { %1933 = vmatmul.mubr.msk.f32.vlgmr.msra.gmra.mrb[14].mxu0 %vm797_vm4, %v971_v1  ;;  %v973_v3 = vmul.f32 %v971_v1, %v796_v31 }
 0x4f7   :  { %1936 = vmatpush3.msra.mxu0 %v2520_v6  ;;  %1937 = vmatprep.mubr.msk.f32.mxu0 %vm2267_vm1, %v2266_v0 }
 0x4f8   :  { %v974_v4 = vsub.f32 %v972_v2, %v973_v3  ;;  %1951 = vmatprep.subr.mxu0 %v2266_v0 }
 0x4fa   :  { %1938 = vmatmul.mubr.msk.f32.vlgmr.msra.gmra.mrb[16].mxu0 %vm797_vm4, %v974_v4 }
 0x4fb   :  { %1953 = vmatprep.mubr.msk.f32.mxu0 %vm2267_vm1, %v2266_v0 }
 0x5c9   :  { %v1044_v5 = vpop.f32.mrb[14].mxu0 }
 0x5ca   :  { %v1124_v9 = vrot.slane %v1044_v5, %v873_v35  ;;  %v1934_v10 = vpop.f32.mrb[15].mxu0 }
 0x5cc   :  { %v1125_v11 = vmul.f32 %v1124_v9, %v2523_v7  ;;  %v1132_v12 = vmul.f32 %v1124_v9, %v2525_v8  ;;  %v1139_v7 = vld [vmem:[#allocation12 + $0x8] sm:$0xff]  ;;  %v1136_v8 = vld [vmem:[#allocation11 + $0x8] sm:$0xff] }
 0x5cd   :  { %v1117_v13 = vpop.f32.mrb[16].mxu0 }
 0x5ce   :  { %v1129_v6 = vrot.slane %v1117_v13, %v873_v35  ;;  %v1939_v14 = vpop.f32.mrb[17].mxu0 }
 0x5d0   :  { %v1130_v15 = vadd.f32 %v1129_v6, %v1125_v11  ;;  %v1133_v16 = vadd.f32 %v1132_v12, %v1129_v6 }
 0x5d2   :  { %v1131_v17 = vmax.f32 %v1130_v15, 0.0  ;;  %v1134_v18 = vmax.f32 %v1133_v16, 0.0 }
 0x5d4   :  { %1941 = vmatpush3.msra.mxu1 %v1134_v18  ;;  %1952 = vmatpush3.msra.mxu0 %v1131_v17 }
 0x5d5   :  { %1943 = vmatmul.mubr.msk.f32.vlgmr.msra.gmra.mrb[16].mxu1 %vm797_vm4, %v1138_v19  ;;  %1954 = vmatmul.mubr.msk.f32.vlgmr.msra.gmra.mrb[18].mxu0 %vm797_vm4, %v1135_v20 }
 0x5d6   :  { %1945 = vmatprep.mubr.msk.f32.mxu1 %vm2267_vm1, %v2266_v0  ;;  %1956 = vmatprep.mubr.msk.f32.mxu0 %vm2267_vm1, %v2266_v0 }
 0x5d7   :  { %1962 = vmatprep.subr.bf16.mxu1 %v2266_v0  ;;  %1986 = vmatprep.subr.bf16.mxu0 %v2266_v0 }
 0x5d8   :  { %1963 = vmatpush3.bf16.msra.mxu1 %v2090_v23  ;;  %1987 = vmatpush3.bf16.msra.mxu0 %v2091_v24 }
 0x5d9   :  { %1946 = vmatmul.mubr.msk.f32.gmra.mrb[18].mxu1 %vm797_vm4, %v1139_v7  ;;  %1957 = vmatmul.mubr.msk.f32.gmra.mrb[20].mxu0 %vm797_vm4, %v1136_v8 }
 0x5da   :  { %1948 = vmatprep.mubr.msk.f32.mxu1 %vm2267_vm1, %v2266_v0  ;;  %1959 = vmatprep.mubr.msk.f32.mxu0 %vm2267_vm1, %v2266_v0 }
 0x5db   :  { %1964 = vmatprep.subr.bf16.mxu1 %v2266_v0  ;;  %1988 = vmatprep.subr.bf16.mxu0 %v2266_v0 }
 0x5dc   :  { %1965 = vmatpush3.bf16.msra.mxu1 %v2092_v25  ;;  %1989 = vmatpush3.bf16.msra.mxu0 %v2093_v26 }
 0x5dd   :  { %1949 = vmatmul.mubr.msk.f32.gmra.mrb[20].mxu1 %vm797_vm4, %v1140_v21  ;;  %1960 = vmatmul.mubr.msk.f32.gmra.mrb[22].mxu0 %vm797_vm4, %v1137_v22 }
 0x5de   :  { %1970 = vmatprep.mubr.msk.bf16.mxu1 %vm2267_vm1, %v2266_v0  ;;  %1994 = vmatprep.mubr.msk.bf16.mxu0 %vm2267_vm1, %v2266_v0 }
 0x5df   :  { %1966 = vmatprep.subr.bf16.mxu1 %v2266_v0  ;;  %1990 = vmatprep.subr.bf16.mxu0 %v2266_v0 }
 0x5e0   :  { %1967 = vmatpush3.bf16.msra.mxu1 %v2094_v27  ;;  %1991 = vmatpush3.bf16.msra.mxu0 %v2095_v28 }
 0x5e1   :  { %1968 = vmatprep.subr.bf16.mxu1 %v2266_v0  ;;  %1992 = vmatprep.subr.bf16.mxu0 %v2266_v0 }
 0x5e4   :  { %1969 = vmatpush3.bf16.msra.mxu1 %v2096_v29  ;;  %1993 = vmatpush3.bf16.msra.mxu0 %v2097_v30 }
 0x5e5   :  { %1974 = vmatprep.subr.bf16.mxu1 %v2266_v0  ;;  %1998 = vmatprep.subr.bf16.mxu0 %v2266_v0 }
 0x6a8   :  { %v1216_v31 = vpop.f32.mrb[16].mxu1  ;;  %v1305_v32 = vpop.f32.mrb[18].mxu0 }
 0x6a9   :  { %v1306_v33 = vadd.f32 %v1305_v32, %v1216_v31  ;;  %v1944_v34 = vpop.f32.mrb[17].mxu1  ;;  %v1955_v35 = vpop.f32.mrb[19].mxu0 }
 0x6ab   :  { %1319 = vst.msk [vmem:[#allocation3] sm:$0xff] %vm438_vm3, %v1306_v33 }
 0x6ac   :  { %v1221_v36 = vpop.f32.mrb[18].mxu1  ;;  %v1310_v37 = vpop.f32.mrb[20].mxu0 }
 0x6ad   :  { %v1311_v38 = vadd.f32 %v1310_v37, %v1221_v36  ;;  %v1947_v39 = vpop.f32.mrb[19].mxu1  ;;  %v1958_v40 = vpop.f32.mrb[21].mxu0 }
 0x6af   :  { %1320 = vst.msk [vmem:[#allocation3 + $0x8] sm:$0xff] %vm438_vm3, %v1311_v38 }
 0x6b0   :  { %v1226_v41 = vpop.f32.mrb[20].mxu1  ;;  %v1315_v42 = vpop.f32.mrb[22].mxu0 }
 0x6b1   :  { %v1316_v43 = vadd.f32 %v1315_v42, %v1226_v41  ;;  %v1950_v44 = vpop.f32.mrb[21].mxu1  ;;  %v1961_v45 = vpop.f32.mrb[23].mxu0 }
 0x6b2   :  { %v1323_v61 = vld [vmem:[#allocation3] sm:$0xff] }
 0x6b3   :  { %1322 = vst.msk [vmem:[#allocation3 + $0x10] sm:$0xf] %vm1321_vm5, %v1316_v43 }
 0x6b6   :  { %v1326_v46 = vld [vmem:[#allocation3 + $0x2] sm:$0xff] }
 0x6b7   :  { %v1329_v50 = vld [vmem:[#allocation3 + $0x4] sm:$0xff] }
 0x6b8   :  { %v1324_v60 = vld [vmem:[#allocation3 + $0x8] sm:$0xff] }
 0x6b9   :  { %v1325_v62 = vpack.c.bf16 %v1324_v60, %v1323_v61 }
 0x6ba   :  { %v1327_v49 = vld [vmem:[#allocation3 + $0xa] sm:$0xff] }
 0x6bb   :  { %v1330_v51 = vld [vmem:[#allocation3 + $0xc] sm:$0xff]  ;;  %v1328_v52 = vpack.c.bf16 %v1327_v49, %v1326_v46 }
 0x6bc   :  { %v1331_v53 = vpack.c.bf16 %v1330_v51, %v1329_v50 }
 0x6bd   :  { %1971 = vmatmul.mubr.msk.bf16.vlgmr.msra.gmra.mrb[24].mxu1 %vm438_vm3, %v1328_v52 }
 0x6be   :  { %1995 = vmatmul.mubr.msk.bf16.vlgmr.msra.gmra.mrb[24].mxu0 %vm438_vm3, %v1331_v53  ;;  %1975 = vmatpush3.bf16.msra.mxu1 %v2098_v47 }
 0x6bf   :  { %1999 = vmatpush3.bf16.msra.mxu0 %v2099_v48  ;;  %1976 = vmatprep.subr.bf16.mxu1 %v2266_v0 }
 0x6c0   :  { %2000 = vmatprep.subr.bf16.mxu0 %v2266_v0  ;;  %1982 = vmatprep.mubr.msk.bf16.mxu1 %vm2267_vm1, %v2266_v0 }
 0x6c1   :  { %2006 = vmatprep.mubr.msk.bf16.mxu0 %vm2267_vm1, %v2266_v0 }
 0x6c2   :  { %1977 = vmatpush3.bf16.msra.mxu1 %v2100_v54 }
 0x6c3   :  { %2001 = vmatpush3.bf16.msra.mxu0 %v2101_v55  ;;  %1978 = vmatprep.subr.bf16.mxu1 %v2266_v0 }
 0x6c4   :  { %2002 = vmatprep.subr.bf16.mxu0 %v2266_v0 }
 0x6c6   :  { %1979 = vmatpush3.bf16.msra.mxu1 %v2102_v56 }
 0x6c7   :  { %2003 = vmatpush3.bf16.msra.mxu0 %v2103_v57  ;;  %1980 = vmatprep.subr.bf16.mxu1 %v2266_v0 }
 0x6c8   :  { %2004 = vmatprep.subr.bf16.mxu0 %v2266_v0 }
 0x6ca   :  { %1981 = vmatpush3.bf16.msra.mxu1 %v2104_v58 }
 0x6cb   :  { %2005 = vmatpush3.bf16.msra.mxu0 %v2105_v59 }
 0x6cd   :  { %1983 = vmatmul.mubr.msk.bf16.vlgmr.msra.gmra.mrb[24].mxu1 %vm438_vm3, %v1325_v62 }
 0x6ce   :  { %2007 = vmatmul.mubr.msk.bf16.vlgmr.msra.gmra.mrb[24].mxu0 %vm438_vm3, %v1328_v52 }
 0x7a0   :  { %v1478_v63 = vpop.f32.mrb[24].mxu1 }
 0x7a1   :  { %v1629_v1 = vpop.f32.mrb[24].mxu0  ;;  %2108 = vtanh.f32 %v1478_v63  ;;  %v1984_v2 = vpop.f32.mrb[25].mxu1 }
 0x7a2   :  { %v2008_v3 = vpop.f32.mrb[25].mxu0  ;;  %2110 = vtanh.f32 %v1629_v1  ;;  %v1481_v4 = vpop.f32.mrb[26].mxu1 }
 0x7a3   :  { %v1632_v5 = vpop.f32.mrb[26].mxu0  ;;  %2112 = vtanh.f32 %v1481_v4  ;;  %v1985_v9 = vpop.f32.mrb[27].mxu1 }
 0x7a4   :  { %v2009_v0 = vpop.f32.mrb[27].mxu0  ;;  %2114 = vtanh.f32 %v1632_v5 }
 0x7ab   :  { %v2109_v10 = vpop.eup %2108 }
 0x7ac   :  { %v2111_v11 = vpop.eup %2110  ;;  %1639 = vst.msk [vmem:[%s2630_s11] sm:$0xff] %vm1638_vm6, %v2109_v10 }
 0x7ad   :  { %v2113_v12 = vpop.eup %2112  ;;  %1643 = vst.msk [vmem:[%s2630_s11 + $0x10] sm:$0xff] %vm1638_vm6, %v2111_v11 }
 0x7ae   :  { %v2115_v13 = vpop.eup %2114  ;;  %1640 = vst.msk [vmem:[%s2630_s11 + $0x8] sm:$0xff] %vm1638_vm6, %v2113_v12 }
 0x7af   :  { %1644 = vst.msk [vmem:[%s2630_s11 + $0x18] sm:$0xff] %vm1638_vm6, %v2115_v13 }
 0x7b0   :  { %1649 = vsyncpa [#allocation5], 1 }
 0x7b1   :  { %1650 = vsyncpa [#allocation7], 1 }
 0x7b2   :  { %1651 = vsyncpa [#allocation10], 1 }
 0x7b3   :  { %1652 = vsyncpa [#allocation13], 1 }

</bundles_post_ra>
